<compile_context>
chip_gen: v6e
topology: v6e:2x2x1
jax: 0.10.0
libtpu: 0.0.40
codegen_flags: <defaults>
</compile_context>

<pallas_src>
import functools
from typing import Any, NamedTuple

import jax
import jax.numpy as jnp
from jax import lax
from jax.experimental import pallas as pl
from jax.experimental.pallas import tpu as pltpu


# ----------------------------------------------------------------------------
# Static metadata (hashable -> static jit argument)
# ----------------------------------------------------------------------------
class CrossConCatMeta(NamedTuple):
    cgp: int            # padded channels of each input (= diff output channels)
    co2p: int           # padded out_channels // 2
    coutp: int          # padded out_channels
    cout: int           # real out_channels
    H: int
    W: int
    imgs_per_block: int  # images sharing one lane block (one grid step)
    compute_dtype: Any


def _round_up(x, m):
    return (x + m - 1) // m * m


# ----------------------------------------------------------------------------
# Fused kernel
# ----------------------------------------------------------------------------
def make_fused_kernel(meta: CrossConCatMeta, block_n: int):
    H, W = meta.H, meta.W
    HW = H * W
    cgp, co2p, coutp = meta.cgp, meta.co2p, meta.coutp
    cmax = max(cgp, co2p)
    ipb = meta.imgs_per_block
    cdt = meta.compute_dtype
    # tap t = dh*3 + dw ; flattened in-image offset of the tap pixel.
    offsets = [(dh - 1) * W + (dw - 1) for dh in range(3) for dw in range(3)]

    # Row offsets inside the packed weight / bias slabs (all tile-aligned).
    r_wd = 0
    r_rc = r_wd + cgp
    r_w2 = r_rc + coutp + co2p
    r_w3 = r_w2 + co2p
    r_end = r_w3 + coutp

    def kernel(x1_ref, x2_ref, m_ref, w_ref, b_ref, o_ref):
        f32 = jnp.float32
        n = block_n

        # Hoisted mask sublane-broadcasts: built once, reused by every taps
        # builder below.  Masks arrive in f32 (exact 0/1) and are cast to the
        # compute dtype so the mask-multiply keeps bf16 dot operands.
        m = m_ref[...]                                              # (9, N) f32
        mask_b = [jnp.broadcast_to(m[t:t + 1, :], (cmax, n)).astype(cdt)
                  for t in range(9)]

        def tap_rows(x):
            """x: (C, N) -> list of 9 masked, lane-rolled tap slabs (C, N).

            Lane rotation = XLU slot (cheap); 0/1 masks reproduce SAME zero
            padding and zero every cross-image wrap when several images share
            the lane axis."""
            c = x.shape[0]
            rows = []
            for t, off in enumerate(offsets):
                if off == 0:
                    rows.append(x)                                   # centre tap
                else:
                    shifted = pltpu.roll(x, (-off) % n, axis=1)
                    mb = mask_b[t] if c == cmax else mask_b[t][:c, :]
                    rows.append(shifted * mb)
            return rows

        x1 = x1_ref[...]                                             # (cgp, N) cdt
        x2 = x2_ref[...]

        # Static sub-blocks of the packed weight / bias slabs.
        wd = w_ref[r_wd:r_rc, 0:18 * cgp]
        wrc = w_ref[r_rc:r_w2, 0:9 * cgp]
        w2 = w_ref[r_w2:r_w3, 0:9 * co2p]
        w3 = w_ref[r_w3:r_end, 0:co2p]
        bd = b_ref[r_wd:r_rc, :]                                     # f32 biases
        brc = b_ref[r_rc:r_w2, :]
        b2 = b_ref[r_w2:r_w3, :]
        b3 = b_ref[r_w3:r_end, :]

        # --- diff: grouped 3x3 + BN + ReLU as ONE matmul over 18 tap rows ----
        # (block-diagonal dense weight; storage-dtype operands, f32 accumulate)
        t18 = jnp.concatenate(tap_rows(x1) + tap_rows(x2), axis=0)   # (18*cgp, N)
        d = jnp.maximum(jnp.dot(wd, t18, preferred_element_type=f32) + bd, 0.0)
        d = d.astype(cdt)
        # TODO(synk): for very small Cg a VPU broadcast-FMA path (18 per-channel
        # FMAs on the rolled slabs) would skip this concat + padded weight; the
        # MXU path is kept for generality.

        # --- conv_res (3x3+BN) fused with conv's 1x1 (+BN+ReLU): ONE matmul ---
        t9 = jnp.concatenate(tap_rows(d), axis=0)                    # (9*cgp, N)
        rc = jnp.dot(wrc, t9, preferred_element_type=f32) + brc      # f32
        r = rc[:coutp, :]                                            # conv_res, no ReLU
        c = jnp.maximum(rc[coutp:, :], 0.0).astype(cdt)              # conv after 1x1

        # --- conv: 3x3 + BN + ReLU, then 1x1 + BN ----------------------------
        t9c = jnp.concatenate(tap_rows(c), axis=0)                   # (9*co2p, N)
        c = jnp.maximum(jnp.dot(w2, t9c, preferred_element_type=f32) + b2, 0.0)
        c = c.astype(cdt)
        c = jnp.dot(w3, c, preferred_element_type=f32) + b3          # (coutp, N) f32

        # --- residual add + final ReLU; per-image lane-dense stores ----------
        y = jnp.maximum(r + c, 0.0)
        for bl in range(ipb):
            o_ref[bl] = y[:, bl * HW:(bl + 1) * HW].astype(cdt)

    return kernel


# ----------------------------------------------------------------------------
# One-time host-side packing (hoisted out of the per-call path)
# ----------------------------------------------------------------------------
def make_tap_masks(H, W):
    """(9, H*W) f32 0/1 masks: mask[t, p] == 1 iff tap t of output pixel p lands
    inside the image (reproduces SAME zero padding after the lane rotation)."""
    idx = jnp.arange(H * W, dtype=jnp.int32)
    i, j = idx // W, idx % W
    rows = []
    for dh in range(3):
        for dw in range(3):
            ok = ((i + dh - 1 >= 0) & (i + dh - 1 < H) &
                  (j + dw - 1 >= 0) & (j + dw - 1 < W))
            rows.append(ok)
    return jnp.stack(rows, axis=0).astype(jnp.float32)


def prepare_cross_concat(params, H, W, batch, num_lane_blocks=2,
                         compute_dtype=jnp.bfloat16):
    """Pack weights/biases/masks once at init (BN already folded in `params`).

    num_lane_blocks: grid length over the batch-packed lane axis.  Keep >=2 on
    v7x (2 TensorCores); 1 gives a single fatter step on v5e/v6e (1 TC).
    Returns (device-buffer dict, static metadata)."""
    f32 = jnp.float32
    cg = params['diff_w1'].shape[1]
    co2 = params['c1_w'].shape[2]
    cout = params['res_w'].shape[2]
    # Pad channels to the native sublane tile of the compute dtype (8 rows for
    # f32, 16 for bf16) so every in-kernel concat / row-slice is tile-aligned.
    gran = 32 // jnp.dtype(compute_dtype).itemsize
    cgp, co2p, coutp = (_round_up(c, gran) for c in (cg, co2, cout))

    num_lane_blocks = max(1, min(num_lane_blocks, batch))
    assert batch % num_lane_blocks == 0, (batch, num_lane_blocks)
    imgs_per_block = batch // num_lane_blocks

    # grouped diff conv -> block-diagonal dense weight (cgp, 18*cgp)
    eye = jnp.eye(cgp, dtype=f32)

    def diag(w):                                      # (9, cg) -> (cgp, 9*cgp)
        wt = jnp.pad(w.T, ((0, cgp - cg), (0, 0)))                  # (cgp, 9)
        return (wt[:, :, None] * eye[:, None, :]).reshape(cgp, 9 * cgp)

    wd = jnp.concatenate([diag(params['diff_w1']), diag(params['diff_w2'])], axis=1)
    bd = jnp.pad(params['diff_b'].reshape(cg, 1), ((0, cgp - cg), (0, 0)))

    def dense(w, b, cinp, coutp_):
        # (taps, cin, co) -> (coutp_, taps*cinp) ;  (1, co) -> (coutp_, 1)
        taps, cin, co = w.shape
        wp = jnp.pad(w, ((0, 0), (0, cinp - cin), (0, coutp_ - co)))
        wk = jnp.transpose(wp, (2, 0, 1)).reshape(coutp_, taps * cinp)
        bk = jnp.pad(b.reshape(co, 1), ((0, coutp_ - co), (0, 0)))
        return wk, bk

    wr, br = dense(params['res_w'], params['res_b'], cgp, coutp)   # 3x3, 9 taps
    w1, b1 = dense(params['c1_w'], params['c1_b'], cgp, co2p)      # 1x1
    w2, b2 = dense(params['c2_w'], params['c2_b'], co2p, co2p)     # 3x3, 9 taps
    w3, b3 = dense(params['c3_w'], params['c3_b'], co2p, coutp)    # 1x1

    # Fuse conv_res with the first 1x1: the 1x1 input is the centre-tap slice
    # (tap index 4) of taps(d), so fold w1 into columns [4*cgp, 5*cgp).
    zpad = jnp.zeros((co2p, 4 * cgp), f32)
    w_rc = jnp.concatenate([wr, jnp.concatenate([zpad, w1, zpad], axis=1)], axis=0)
    b_rc = jnp.concatenate([br, b1], axis=0)

    # One weight slab (compute dtype) + one bias slab (f32, added to f32 acc).
    kmax = max(18 * cgp, 9 * cgp, 9 * co2p, co2p)
    padk = lambda w: jnp.pad(w, ((0, 0), (0, kmax - w.shape[1])))
    w_slab = jnp.concatenate([padk(wd), padk(w_rc), padk(w2), padk(w3)],
                             axis=0).astype(compute_dtype)
    b_slab = jnp.concatenate([bd, b_rc, b2, b3], axis=0).astype(f32)

    # Per-image boundary masks, tiled across the images sharing one lane block.
    # Kept in f32 (exact 0/1); cast once inside the kernel after the broadcast.
    masks = jnp.tile(make_tap_masks(H, W), (1, imgs_per_block))

    bufs = dict(w=w_slab, b=b_slab, masks=masks)
    meta = CrossConCatMeta(cgp=cgp, co2p=co2p, coutp=coutp, cout=cout, H=H, W=W,
                           imgs_per_block=imgs_per_block,
                           compute_dtype=compute_dtype)
    return bufs, meta


# ----------------------------------------------------------------------------
# Forward pass (single fused Pallas call)
# ----------------------------------------------------------------------------
@functools.partial(jax.jit, static_argnums=(3,))
def cross_concat_forward(x1_nchw, x2_nchw, bufs, meta: CrossConCatMeta):
    B, C, H, W = x1_nchw.shape
    assert (H, W) == (meta.H, meta.W)
    HW = H * W
    cgp, coutp, cout = meta.cgp, meta.coutp, meta.cout
    ipb = meta.imgs_per_block
    cdt = meta.compute_dtype
    assert B % ipb == 0, (B, ipb)
    nb = B // ipb                         # grid length (lane blocks)
    block_n = ipb * HW
    if nb > 1:
        assert block_n % 128 == 0, "lane blocks must be 128-lane aligned"

    def to_slab(x):    # NCHW -> lane-packed, channel-padded (Cgp, B*HW)
        x = x.reshape(B, C, HW).transpose(1, 0, 2).reshape(C, B * HW)
        return jnp.pad(x, ((0, cgp - C), (0, 0))).astype(cdt)

    x1 = to_slab(x1_nchw)
    x2 = to_slab(x2_nchw)

    kernel = make_fused_kernel(meta, block_n)
    rep = lambda a: pl.BlockSpec(a.shape, lambda i: (0, 0))   # replicated operand
    act = pl.BlockSpec((cgp, block_n), lambda i: (0, i))      # lane-axis blocking

    out = pl.pallas_call(
        kernel,
        out_shape=jax.ShapeDtypeStruct((B, coutp, HW), cdt),
        grid=(nb,),
        in_specs=[act, act, rep(bufs['masks']), rep(bufs['w']), rep(bufs['b'])],
        out_specs=pl.BlockSpec((ipb, coutp, HW), lambda i: (i, 0, 0)),
        compiler_params=pltpu.CompilerParams(
            dimension_semantics=("parallel",)),
    )(x1, x2, bufs['masks'], bufs['w'], bufs['b'])

    if coutp != cout:
        out = out[:, :cout, :]
    return out.reshape(B, cout, H, W)


# ----------------------------------------------------------------------------
# Parameter init (BN folded, inference mode) and pure-JAX reference
# ----------------------------------------------------------------------------
def init_params(key, in_channels, out_channels, eps=1e-5):
    cg = in_channels                 # channels of EACH input / diff groups
    co2 = out_channels // 2
    keys = iter(jax.random.split(key, 8))

    def bn_params(k, c):
        k1, k2, k3, k4 = jax.random.split(k, 4)
        gamma = 1.0 + 0.1 * jax.random.normal(k1, (c,), jnp.float32)
        beta = 0.1 * jax.random.normal(k2, (c,), jnp.float32)
        mean = 0.1 * jax.random.normal(k3, (c,), jnp.float32)
        var = 0.5 + jax.random.uniform(k4, (c,), jnp.float32)
        return gamma, beta, mean, var

    p = {}
    # diff: PyTorch grouped weight (cg, 2, 3, 3) + bias (cg,) + BN(cg)
    k1, k2, k3 = jax.random.split(next(keys), 3)
    w_diff = 0.3 * jax.random.normal(k1, (cg, 2, 3, 3), jnp.float32)
    b_diff = 0.1 * jax.random.normal(k2, (cg,), jnp.float32)
    g, bt, mu, var = bn_params(k3, cg)
    s = g / jnp.sqrt(var + eps)
    p['diff_w1'] = jnp.transpose(w_diff[:, 0] * s[:, None, None], (1, 2, 0)).reshape(9, cg)
    p['diff_w2'] = jnp.transpose(w_diff[:, 1] * s[:, None, None], (1, 2, 0)).reshape(9, cg)
    p['diff_b'] = ((b_diff - mu) * s + bt).reshape(1, cg)

    def dense_conv(kk, cin, cout_, kkey):
        ka, kb, kc = jax.random.split(kkey, 3)
        w = (0.3 / jnp.sqrt(kk * kk * cin)) * jax.random.normal(
            ka, (kk, kk, cin, cout_), jnp.float32)
        b = 0.1 * jax.random.normal(kb, (cout_,), jnp.float32)
        g, bt, mu, var = bn_params(kc, cout_)
        s = g / jnp.sqrt(var + eps)
        w_f = (w * s).reshape(kk * kk, cin, cout_)           # (taps, Cin, Cout)
        b_f = ((b - mu) * s + bt).reshape(1, cout_)
        return w_f, b_f

    p['res_w'], p['res_b'] = dense_conv(3, cg, out_channels, next(keys))
    p['c1_w'], p['c1_b'] = dense_conv(1, cg, co2, next(keys))
    p['c2_w'], p['c2_b'] = dense_conv(3, co2, co2, next(keys))
    p['c3_w'], p['c3_b'] = dense_conv(1, co2, out_channels, next(keys))
    return p


def reference_forward(x1_nchw, x2_nchw, p):
    x1 = jnp.transpose(x1_nchw, (0, 2, 3, 1)).astype(jnp.float32)
    x2 = jnp.transpose(x2_nchw, (0, 2, 3, 1)).astype(jnp.float32)
    B, H, W, cg = x1.shape
    dn = ('NHWC', 'HWIO', 'NHWC')
    prec = lax.Precision.HIGHEST
    # channel interleave, like torch.cat([x1.unsqueeze(2), x2.unsqueeze(2)], 2).reshape(...)
    x = jnp.stack([x1, x2], axis=-1).reshape(B, H, W, 2 * cg)
    w_diff = jnp.stack([p['diff_w1'], p['diff_w2']], axis=1).reshape(3, 3, 2, cg)
    d = lax.conv_general_dilated(x, w_diff, (1, 1), 'SAME', dimension_numbers=dn,
                                 feature_group_count=cg, precision=prec) + p['diff_b']
    d = jnp.maximum(d, 0.0)

    def conv(inp, w, b, k, relu):
        wk = w.reshape(k, k, w.shape[1], w.shape[2])
        y = lax.conv_general_dilated(inp, wk, (1, 1), 'SAME',
                                     dimension_numbers=dn, precision=prec) + b
        return jnp.maximum(y, 0.0) if relu else y

    r = conv(d, p['res_w'], p['res_b'], 3, False)
    c = conv(d, p['c1_w'], p['c1_b'], 1, True)
    c = conv(c, p['c2_w'], p['c2_b'], 3, True)
    c = conv(c, p['c3_w'], p['c3_b'], 1, False)
    out = jnp.maximum(r + c, 0.0)
    return jnp.transpose(out, (0, 3, 1, 2))


if __name__ == "__main__":
    key = jax.random.PRNGKey(0)
    k1, k2, kp_key = jax.random.split(key, 3)

    B, C, H, W = 2, 4, 16, 16            # inputs1 / inputs2: (B, C, H, W) NCHW
    in_channels, out_channels = C, 8     # Cross_ConCat(in_channels, out_channels)

    x1 = jax.random.normal(k1, (B, C, H, W), jnp.float32)
    x2 = jax.random.normal(k2, (B, C, H, W), jnp.float32)
    params = init_params(kp_key, in_channels, out_channels)

    ref = jax.block_until_ready(reference_forward(x1, x2, params))

    # (compute dtype, num_lane_blocks, rtol/atol)
    #   num_lane_blocks=2: >= 2 parallel grid steps -> both v7x TensorCores busy
    #   num_lane_blocks=1: single fatter step (N = B*H*W), best on v5e/v6e (1 TC)
    configs = [
        (jnp.float32, 2, 2e-3),    # tight check vs HIGHEST-precision lax.conv
        (jnp.bfloat16, 2, 1e-1),   # bf16 storage + native-rate bf16 MXU operands
        (jnp.bfloat16, 1, 1e-1),   # collapsed grid: one step over the whole batch
    ]
    for cdt, nblk, tol in configs:
        bufs, meta = prepare_cross_concat(params, H, W, batch=B,
                                          num_lane_blocks=nblk,
                                          compute_dtype=cdt)
        out = jax.block_until_ready(cross_concat_forward(x1, x2, bufs, meta))
        assert out.shape == (B, out_channels, H, W), out.shape
        out32 = out.astype(jnp.float32)
        err = float(jnp.max(jnp.abs(out32 - ref)))
        assert bool(jnp.allclose(out32, ref, rtol=tol, atol=tol)), (str(cdt), nblk, err)

    print("KERNEL_OK")
</pallas_src>

<mosaic_0001>
module attributes {stable_mosaic.version = 11 : i64} {
  func.func @kernel(%arg0: i32, %arg1: memref<8x256xf32, #tpu.memory_space<vmem>>, %arg2: memref<8x256xf32, #tpu.memory_space<vmem>>, %arg3: memref<9x256xf32, #tpu.memory_space<vmem>>, %arg4: memref<40x144xf32, #tpu.memory_space<vmem>>, %arg5: memref<40x1xf32, #tpu.memory_space<vmem>>, %arg6: memref<1x8x256xf32, #tpu.memory_space<vmem>>) attributes {dimension_semantics = [#tpu.dimension_semantics<parallel>], iteration_bounds = array<i64: 2>, scalar_prefetch = 0 : i64, scratch_operands = 0 : i64, tpu.core_type = #tpu.core_type<tc>, window_params = [{transform_indices = @transform_0, window_bounds = array<i64: 8, 256>}, {transform_indices = @transform_1, window_bounds = array<i64: 8, 256>}, {pipeline_mode = #tpu.pipeline_mode<synchronous>, transform_indices = @transform_2, window_bounds = array<i64: 9, 256>}, {pipeline_mode = #tpu.pipeline_mode<synchronous>, transform_indices = @transform_3, window_bounds = array<i64: 40, 144>}, {pipeline_mode = #tpu.pipeline_mode<synchronous>, transform_indices = @transform_4, window_bounds = array<i64: 40, 1>}, {transform_indices = @transform_5, window_bounds = array<i64: 1, 8, 256>}]} {
    %c0 = arith.constant 0 : index
    %c0_0 = arith.constant 0 : index
    %0 = vector.load %arg3[%c0, %c0_0] : memref<9x256xf32, #tpu.memory_space<vmem>>, vector<9x256xf32>
    %1 = vector.extract_strided_slice %0 {offsets = [0, 0], sizes = [1, 256], strides = [1, 1]} : vector<9x256xf32> to vector<1x256xf32>
    %2 = vector.shape_cast %1 : vector<1x256xf32> to vector<1x256xf32>
    %3 = vector.broadcast %2 : vector<1x256xf32> to vector<8x256xf32>
    %4 = vector.extract_strided_slice %0 {offsets = [1, 0], sizes = [1, 256], strides = [1, 1]} : vector<9x256xf32> to vector<1x256xf32>
    %5 = vector.shape_cast %4 : vector<1x256xf32> to vector<1x256xf32>
    %6 = vector.broadcast %5 : vector<1x256xf32> to vector<8x256xf32>
    %7 = vector.extract_strided_slice %0 {offsets = [2, 0], sizes = [1, 256], strides = [1, 1]} : vector<9x256xf32> to vector<1x256xf32>
    %8 = vector.shape_cast %7 : vector<1x256xf32> to vector<1x256xf32>
    %9 = vector.broadcast %8 : vector<1x256xf32> to vector<8x256xf32>
    %10 = vector.extract_strided_slice %0 {offsets = [3, 0], sizes = [1, 256], strides = [1, 1]} : vector<9x256xf32> to vector<1x256xf32>
    %11 = vector.shape_cast %10 : vector<1x256xf32> to vector<1x256xf32>
    %12 = vector.broadcast %11 : vector<1x256xf32> to vector<8x256xf32>
    %13 = vector.extract_strided_slice %0 {offsets = [5, 0], sizes = [1, 256], strides = [1, 1]} : vector<9x256xf32> to vector<1x256xf32>
    %14 = vector.shape_cast %13 : vector<1x256xf32> to vector<1x256xf32>
    %15 = vector.broadcast %14 : vector<1x256xf32> to vector<8x256xf32>
    %16 = vector.extract_strided_slice %0 {offsets = [6, 0], sizes = [1, 256], strides = [1, 1]} : vector<9x256xf32> to vector<1x256xf32>
    %17 = vector.shape_cast %16 : vector<1x256xf32> to vector<1x256xf32>
    %18 = vector.broadcast %17 : vector<1x256xf32> to vector<8x256xf32>
    %19 = vector.extract_strided_slice %0 {offsets = [7, 0], sizes = [1, 256], strides = [1, 1]} : vector<9x256xf32> to vector<1x256xf32>
    %20 = vector.shape_cast %19 : vector<1x256xf32> to vector<1x256xf32>
    %21 = vector.broadcast %20 : vector<1x256xf32> to vector<8x256xf32>
    %22 = vector.extract_strided_slice %0 {offsets = [8, 0], sizes = [1, 256], strides = [1, 1]} : vector<9x256xf32> to vector<1x256xf32>
    %23 = vector.shape_cast %22 : vector<1x256xf32> to vector<1x256xf32>
    %24 = vector.broadcast %23 : vector<1x256xf32> to vector<8x256xf32>
    %c0_1 = arith.constant 0 : index
    %c0_2 = arith.constant 0 : index
    %25 = vector.load %arg1[%c0_1, %c0_2] : memref<8x256xf32, #tpu.memory_space<vmem>>, vector<8x256xf32>
    %c0_3 = arith.constant 0 : index
    %c0_4 = arith.constant 0 : index
    %26 = vector.load %arg2[%c0_3, %c0_4] : memref<8x256xf32, #tpu.memory_space<vmem>>, vector<8x256xf32>
    %c0_5 = arith.constant 0 : index
    %c0_6 = arith.constant 0 : index
    %27 = vector.load %arg4[%c0_5, %c0_6] : memref<40x144xf32, #tpu.memory_space<vmem>>, vector<8x144xf32>
    %c8 = arith.constant 8 : index
    %c0_7 = arith.constant 0 : index
    %28 = vector.load %arg4[%c8, %c0_7] : memref<40x144xf32, #tpu.memory_space<vmem>>, vector<16x72xf32>
    %c24 = arith.constant 24 : index
    %c0_8 = arith.constant 0 : index
    %29 = vector.load %arg4[%c24, %c0_8] : memref<40x144xf32, #tpu.memory_space<vmem>>, vector<8x72xf32>
    %c32 = arith.constant 32 : index
    %c0_9 = arith.constant 0 : index
    %30 = vector.load %arg4[%c32, %c0_9] : memref<40x144xf32, #tpu.memory_space<vmem>>, vector<8x8xf32>
    %c0_10 = arith.constant 0 : index
    %c0_11 = arith.constant 0 : index
    %31 = vector.load %arg5[%c0_10, %c0_11] : memref<40x1xf32, #tpu.memory_space<vmem>>, vector<8x1xf32>
    %c8_12 = arith.constant 8 : index
    %c0_13 = arith.constant 0 : index
    %32 = vector.load %arg5[%c8_12, %c0_13] : memref<40x1xf32, #tpu.memory_space<vmem>>, vector<16x1xf32>
    %c24_14 = arith.constant 24 : index
    %c0_15 = arith.constant 0 : index
    %33 = vector.load %arg5[%c24_14, %c0_15] : memref<40x1xf32, #tpu.memory_space<vmem>>, vector<8x1xf32>
    %c32_16 = arith.constant 32 : index
    %c0_17 = arith.constant 0 : index
    %34 = vector.load %arg5[%c32_16, %c0_17] : memref<40x1xf32, #tpu.memory_space<vmem>>, vector<8x1xf32>
    %c17_i32 = arith.constant 17 : i32
    %35 = tpu.dynamic_rotate %25 by %c17_i32 dim 1 : vector<8x256xf32>, i32 -> vector<8x256xf32>
    %36 = arith.mulf %35, %3 : vector<8x256xf32>
    %c16_i32 = arith.constant 16 : i32
    %37 = tpu.dynamic_rotate %25 by %c16_i32 dim 1 : vector<8x256xf32>, i32 -> vector<8x256xf32>
    %38 = arith.mulf %37, %6 : vector<8x256xf32>
    %c15_i32 = arith.constant 15 : i32
    %39 = tpu.dynamic_rotate %25 by %c15_i32 dim 1 : vector<8x256xf32>, i32 -> vector<8x256xf32>
    %40 = arith.mulf %39, %9 : vector<8x256xf32>
    %c1_i32 = arith.constant 1 : i32
    %41 = tpu.dynamic_rotate %25 by %c1_i32 dim 1 : vector<8x256xf32>, i32 -> vector<8x256xf32>
    %42 = arith.mulf %41, %12 : vector<8x256xf32>
    %c255_i32 = arith.constant 255 : i32
    %43 = tpu.dynamic_rotate %25 by %c255_i32 dim 1 : vector<8x256xf32>, i32 -> vector<8x256xf32>
    %44 = arith.mulf %43, %15 : vector<8x256xf32>
    %c241_i32 = arith.constant 241 : i32
    %45 = tpu.dynamic_rotate %25 by %c241_i32 dim 1 : vector<8x256xf32>, i32 -> vector<8x256xf32>
    %46 = arith.mulf %45, %18 : vector<8x256xf32>
    %c240_i32 = arith.constant 240 : i32
    %47 = tpu.dynamic_rotate %25 by %c240_i32 dim 1 : vector<8x256xf32>, i32 -> vector<8x256xf32>
    %48 = arith.mulf %47, %21 : vector<8x256xf32>
    %c239_i32 = arith.constant 239 : i32
    %49 = tpu.dynamic_rotate %25 by %c239_i32 dim 1 : vector<8x256xf32>, i32 -> vector<8x256xf32>
    %50 = arith.mulf %49, %24 : vector<8x256xf32>
    %c17_i32_18 = arith.constant 17 : i32
    %51 = tpu.dynamic_rotate %26 by %c17_i32_18 dim 1 : vector<8x256xf32>, i32 -> vector<8x256xf32>
    %52 = arith.mulf %51, %3 : vector<8x256xf32>
    %c16_i32_19 = arith.constant 16 : i32
    %53 = tpu.dynamic_rotate %26 by %c16_i32_19 dim 1 : vector<8x256xf32>, i32 -> vector<8x256xf32>
    %54 = arith.mulf %53, %6 : vector<8x256xf32>
    %c15_i32_20 = arith.constant 15 : i32
    %55 = tpu.dynamic_rotate %26 by %c15_i32_20 dim 1 : vector<8x256xf32>, i32 -> vector<8x256xf32>
    %56 = arith.mulf %55, %9 : vector<8x256xf32>
    %c1_i32_21 = arith.constant 1 : i32
    %57 = tpu.dynamic_rotate %26 by %c1_i32_21 dim 1 : vector<8x256xf32>, i32 -> vector<8x256xf32>
    %58 = arith.mulf %57, %12 : vector<8x256xf32>
    %c255_i32_22 = arith.constant 255 : i32
    %59 = tpu.dynamic_rotate %26 by %c255_i32_22 dim 1 : vector<8x256xf32>, i32 -> vector<8x256xf32>
    %60 = arith.mulf %59, %15 : vector<8x256xf32>
    %c241_i32_23 = arith.constant 241 : i32
    %61 = tpu.dynamic_rotate %26 by %c241_i32_23 dim 1 : vector<8x256xf32>, i32 -> vector<8x256xf32>
    %62 = arith.mulf %61, %18 : vector<8x256xf32>
    %c240_i32_24 = arith.constant 240 : i32
    %63 = tpu.dynamic_rotate %26 by %c240_i32_24 dim 1 : vector<8x256xf32>, i32 -> vector<8x256xf32>
    %64 = arith.mulf %63, %21 : vector<8x256xf32>
    %c239_i32_25 = arith.constant 239 : i32
    %65 = tpu.dynamic_rotate %26 by %c239_i32_25 dim 1 : vector<8x256xf32>, i32 -> vector<8x256xf32>
    %66 = arith.mulf %65, %24 : vector<8x256xf32>
    %67 = tpu.concatenate %36, %38, %40, %42, %25, %44, %46, %48, %50, %52, %54, %56, %58, %26, %60, %62 in 0 : vector<8x256xf32>, vector<8x256xf32>, vector<8x256xf32>, vector<8x256xf32>, vector<8x256xf32>, vector<8x256xf32>, vector<8x256xf32>, vector<8x256xf32>, vector<8x256xf32>, vector<8x256xf32>, vector<8x256xf32>, vector<8x256xf32>, vector<8x256xf32>, vector<8x256xf32>, vector<8x256xf32>, vector<8x256xf32> -> vector<128x256xf32>
    %68 = tpu.concatenate %64, %66 in 0 : vector<8x256xf32>, vector<8x256xf32> -> vector<16x256xf32>
    %69 = tpu.concatenate %67, %68 in 0 : vector<128x256xf32>, vector<16x256xf32> -> vector<144x256xf32>
    %cst = arith.constant dense<0.000000e+00> : vector<8x256xf32>
    %70 = tpu.matmul %27, %69, %cst {dimension_numbers = #tpu.dot_dimension_numbers<[1], [0], [0], [1], [0, 0, 1, 1], [], []>} : vector<8x144xf32>, vector<144x256xf32>, vector<8x256xf32> -> vector<8x256xf32>
    %71 = vector.broadcast %31 : vector<8x1xf32> to vector<8x256xf32>
    %72 = arith.addf %70, %71 : vector<8x256xf32>
    %cst_26 = arith.constant 0.000000e+00 : f32
    %73 = vector.broadcast %cst_26 : f32 to vector<8x256xf32>
    %74 = arith.maximumf %72, %73 : vector<8x256xf32>
    %c17_i32_27 = arith.constant 17 : i32
    %75 = tpu.dynamic_rotate %74 by %c17_i32_27 dim 1 : vector<8x256xf32>, i32 -> vector<8x256xf32>
    %76 = arith.mulf %75, %3 : vector<8x256xf32>
    %c16_i32_28 = arith.constant 16 : i32
    %77 = tpu.dynamic_rotate %74 by %c16_i32_28 dim 1 : vector<8x256xf32>, i32 -> vector<8x256xf32>
    %78 = arith.mulf %77, %6 : vector<8x256xf32>
    %c15_i32_29 = arith.constant 15 : i32
    %79 = tpu.dynamic_rotate %74 by %c15_i32_29 dim 1 : vector<8x256xf32>, i32 -> vector<8x256xf32>
    %80 = arith.mulf %79, %9 : vector<8x256xf32>
    %c1_i32_30 = arith.constant 1 : i32
    %81 = tpu.dynamic_rotate %74 by %c1_i32_30 dim 1 : vector<8x256xf32>, i32 -> vector<8x256xf32>
    %82 = arith.mulf %81, %12 : vector<8x256xf32>
    %c255_i32_31 = arith.constant 255 : i32
    %83 = tpu.dynamic_rotate %74 by %c255_i32_31 dim 1 : vector<8x256xf32>, i32 -> vector<8x256xf32>
    %84 = arith.mulf %83, %15 : vector<8x256xf32>
    %c241_i32_32 = arith.constant 241 : i32
    %85 = tpu.dynamic_rotate %74 by %c241_i32_32 dim 1 : vector<8x256xf32>, i32 -> vector<8x256xf32>
    %86 = arith.mulf %85, %18 : vector<8x256xf32>
    %c240_i32_33 = arith.constant 240 : i32
    %87 = tpu.dynamic_rotate %74 by %c240_i32_33 dim 1 : vector<8x256xf32>, i32 -> vector<8x256xf32>
    %88 = arith.mulf %87, %21 : vector<8x256xf32>
    %c239_i32_34 = arith.constant 239 : i32
    %89 = tpu.dynamic_rotate %74 by %c239_i32_34 dim 1 : vector<8x256xf32>, i32 -> vector<8x256xf32>
    %90 = arith.mulf %89, %24 : vector<8x256xf32>
    %91 = tpu.concatenate %76, %78, %80, %82, %74, %84, %86, %88, %90 in 0 : vector<8x256xf32>, vector<8x256xf32>, vector<8x256xf32>, vector<8x256xf32>, vector<8x256xf32>, vector<8x256xf32>, vector<8x256xf32>, vector<8x256xf32>, vector<8x256xf32> -> vector<72x256xf32>
    %cst_35 = arith.constant dense<0.000000e+00> : vector<16x256xf32>
    %92 = tpu.matmul %28, %91, %cst_35 {dimension_numbers = #tpu.dot_dimension_numbers<[1], [0], [0], [1], [0, 0, 1, 1], [], []>} : vector<16x72xf32>, vector<72x256xf32>, vector<16x256xf32> -> vector<16x256xf32>
    %93 = vector.broadcast %32 : vector<16x1xf32> to vector<16x256xf32>
    %94 = arith.addf %92, %93 : vector<16x256xf32>
    %95 = vector.extract_strided_slice %94 {offsets = [0, 0], sizes = [8, 256], strides = [1, 1]} : vector<16x256xf32> to vector<8x256xf32>
    %96 = vector.extract_strided_slice %94 {offsets = [8, 0], sizes = [8, 256], strides = [1, 1]} : vector<16x256xf32> to vector<8x256xf32>
    %cst_36 = arith.constant 0.000000e+00 : f32
    %97 = vector.broadcast %cst_36 : f32 to vector<8x256xf32>
    %98 = arith.maximumf %96, %97 : vector<8x256xf32>
    %c17_i32_37 = arith.constant 17 : i32
    %99 = tpu.dynamic_rotate %98 by %c17_i32_37 dim 1 : vector<8x256xf32>, i32 -> vector<8x256xf32>
    %100 = arith.mulf %99, %3 : vector<8x256xf32>
    %c16_i32_38 = arith.constant 16 : i32
    %101 = tpu.dynamic_rotate %98 by %c16_i32_38 dim 1 : vector<8x256xf32>, i32 -> vector<8x256xf32>
    %102 = arith.mulf %101, %6 : vector<8x256xf32>
    %c15_i32_39 = arith.constant 15 : i32
    %103 = tpu.dynamic_rotate %98 by %c15_i32_39 dim 1 : vector<8x256xf32>, i32 -> vector<8x256xf32>
    %104 = arith.mulf %103, %9 : vector<8x256xf32>
    %c1_i32_40 = arith.constant 1 : i32
    %105 = tpu.dynamic_rotate %98 by %c1_i32_40 dim 1 : vector<8x256xf32>, i32 -> vector<8x256xf32>
    %106 = arith.mulf %105, %12 : vector<8x256xf32>
    %c255_i32_41 = arith.constant 255 : i32
    %107 = tpu.dynamic_rotate %98 by %c255_i32_41 dim 1 : vector<8x256xf32>, i32 -> vector<8x256xf32>
    %108 = arith.mulf %107, %15 : vector<8x256xf32>
    %c241_i32_42 = arith.constant 241 : i32
    %109 = tpu.dynamic_rotate %98 by %c241_i32_42 dim 1 : vector<8x256xf32>, i32 -> vector<8x256xf32>
    %110 = arith.mulf %109, %18 : vector<8x256xf32>
    %c240_i32_43 = arith.constant 240 : i32
    %111 = tpu.dynamic_rotate %98 by %c240_i32_43 dim 1 : vector<8x256xf32>, i32 -> vector<8x256xf32>
    %112 = arith.mulf %111, %21 : vector<8x256xf32>
    %c239_i32_44 = arith.constant 239 : i32
    %113 = tpu.dynamic_rotate %98 by %c239_i32_44 dim 1 : vector<8x256xf32>, i32 -> vector<8x256xf32>
    %114 = arith.mulf %113, %24 : vector<8x256xf32>
    %115 = tpu.concatenate %100, %102, %104, %106, %98, %108, %110, %112, %114 in 0 : vector<8x256xf32>, vector<8x256xf32>, vector<8x256xf32>, vector<8x256xf32>, vector<8x256xf32>, vector<8x256xf32>, vector<8x256xf32>, vector<8x256xf32>, vector<8x256xf32> -> vector<72x256xf32>
    %cst_45 = arith.constant dense<0.000000e+00> : vector<8x256xf32>
    %116 = tpu.matmul %29, %115, %cst_45 {dimension_numbers = #tpu.dot_dimension_numbers<[1], [0], [0], [1], [0, 0, 1, 1], [], []>} : vector<8x72xf32>, vector<72x256xf32>, vector<8x256xf32> -> vector<8x256xf32>
    %117 = vector.broadcast %33 : vector<8x1xf32> to vector<8x256xf32>
    %118 = arith.addf %116, %117 : vector<8x256xf32>
    %cst_46 = arith.constant 0.000000e+00 : f32
    %119 = vector.broadcast %cst_46 : f32 to vector<8x256xf32>
    %120 = arith.maximumf %118, %119 : vector<8x256xf32>
    %cst_47 = arith.constant dense<0.000000e+00> : vector<8x256xf32>
    %121 = tpu.matmul %30, %120, %cst_47 {dimension_numbers = #tpu.dot_dimension_numbers<[1], [0], [0], [1], [0, 0, 1, 1], [], []>} : vector<8x8xf32>, vector<8x256xf32>, vector<8x256xf32> -> vector<8x256xf32>
    %122 = vector.broadcast %34 : vector<8x1xf32> to vector<8x256xf32>
    %123 = arith.addf %121, %122 : vector<8x256xf32>
    %124 = arith.addf %95, %123 : vector<8x256xf32>
    %cst_48 = arith.constant 0.000000e+00 : f32
    %125 = vector.broadcast %cst_48 : f32 to vector<8x256xf32>
    %126 = arith.maximumf %124, %125 : vector<8x256xf32>
    %c0_49 = arith.constant 0 : index
    %c0_50 = arith.constant 0 : index
    %c0_51 = arith.constant 0 : index
    %127 = vector.load %arg6[%c0_49, %c0_50, %c0_51] : memref<1x8x256xf32, #tpu.memory_space<vmem>>, vector<1x8x256xf32>
    %128 = vector.shape_cast %127 : vector<1x8x256xf32> to vector<8x256xf32>
    %129 = vector.shape_cast %126 : vector<8x256xf32> to vector<1x8x256xf32>
    tpu.vector_store %arg6[%c0_49, %c0_50, %c0_51], %129 {strides = array<i32>} : memref<1x8x256xf32, #tpu.memory_space<vmem>>, vector<1x8x256xf32>,
    return
  }
  func.func @transform_0(%arg0: i32) -> (i32, i32) {
    %c0_i32 = arith.constant 0 : i32
    %c0_i32_0 = arith.constant 0 : i32
    return %c0_i32, %arg0 : i32, i32
  }
  func.func @transform_1(%arg0: i32) -> (i32, i32) {
    %c0_i32 = arith.constant 0 : i32
    %c0_i32_0 = arith.constant 0 : i32
    return %c0_i32, %arg0 : i32, i32
  }
  func.func @transform_2(%arg0: i32) -> (i32, i32) {
    %c0_i32 = arith.constant 0 : i32
    %c0_i32_0 = arith.constant 0 : i32
    %c0_i32_1 = arith.constant 0 : i32
    return %c0_i32, %c0_i32_0 : i32, i32
  }
  func.func @transform_3(%arg0: i32) -> (i32, i32) {
    %c0_i32 = arith.constant 0 : i32
    %c0_i32_0 = arith.constant 0 : i32
    %c0_i32_1 = arith.constant 0 : i32
    return %c0_i32, %c0_i32_0 : i32, i32
  }
  func.func @transform_4(%arg0: i32) -> (i32, i32) {
    %c0_i32 = arith.constant 0 : i32
    %c0_i32_0 = arith.constant 0 : i32
    %c0_i32_1 = arith.constant 0 : i32
    return %c0_i32, %c0_i32_0 : i32, i32
  }
  func.func @transform_5(%arg0: i32) -> (i32, i32, i32) {
    %c0_i32 = arith.constant 0 : i32
    %c0_i32_0 = arith.constant 0 : i32
    %c0_i32_1 = arith.constant 0 : i32
    return %arg0, %c0_i32, %c0_i32_0 : i32, i32, i32
  }
}

</mosaic_0001>

<bundles_post_ra>
// kernel: cross_concat_forward.1
= control target key start
LH: loop header
LB: loop body
LE: loop exit
PB: predicated region body
PF: predicated region fallthrough
CT: control target
= control target key end

     0   :  { %s1099_s18 = smov 0   ;;  %s1573_s0 = inlined_call_operand.vmem [shape: f32[8,512], index: 0, kind: input, shape index: {}]   ;;  %s1574_s1 = inlined_call_operand.vmem [shape: f32[8,512], index: 1, kind: input, shape index: {}]   ;;  %s1575_s2 = inlined_call_operand.vmem [shape: f32[9,256], index: 2, kind: input, shape index: {}]   ;;  %s1576_s3 = inlined_call_operand.vmem [shape: f32[40,144], index: 3, kind: input, shape index: {}]   ;;  %s1577_s4 = inlined_call_operand.vmem [shape: f32[40,1], index: 4, kind: input, shape index: {}]   ;;  %s1578_s5 = inlined_call_operand.vmem [shape: f32[2,8,256], index: 5, kind: output, shape index: {}]  }
   0x1 LB: > { %s1105_s19 = sadd.s32 4294967295, %s1057_s18   ;;  %p1014_p0 = scmp.ge.s32.totalorder %s1057_s18, 1  ;;  %s1057_s18 = sphi %s1099_s18, %s15_s18  }
   0x2   : > { %p199_p1 = scmp.lt.s32.totalorder %s1057_s18, 3 }
   0x4   : > { %p200_p2 = pnand %p1014_p0, %p199_p1 }
   0x5   : > { %s1015_s20 = sshll.u32 (!%p200_p2), %s1105_s19, 1  ;;  %s1059_s25 = smov (!%p200_p2), 127  }
   0x6   : > { %203 = sbr.rel (%p200_p2) target bundleno = 1298 (0x512), region = 40  ;;  %p233_p3 = scmp.lt.s32.totalorder (!%p200_p2), %s1015_s20, 3 }
   0x7   : > { %s1060_s26 = smov (!%p200_p2), 113   ;;  %s1061_s27 = smov (!%p200_p2), 1  }
   0x8   : > { %s1062_s28 = smov (!%p200_p2), 15   ;;  %s1063_s29 = smov (!%p200_p2), 16  }
   0x9   : > { %s1064_s8 = smov (!%p200_p2), 17   ;;  %s1065_s9 = smov (!%p200_p2), 111  }
   0xa   : > { %s1066_s10 = smov (!%p200_p2), 112   ;;  %p244_p4 = scmp.lt.s32.totalorder (!%p200_p2), %s1105_s19, 1 }
   0xb   : > { %s1580_s20 = smov (!%p233_p3, %s1015_s20), 3  ;;  %v322_v4 = vld [vmem:[%s1576_s3 + $0x8] sm:$0xff]  ;;  %vm475_vm0 = vcmask 130048   ;;  %v1067_v5 = vmov 0   ;;  %v327_v6 = vld [vmem:[%s1577_s4] sm:$0xff]  ;;  %v253_v7 = vlaneseq  ;;  %vm626_vm9 = vcmask 588800  }
   0xc   : > { %s1016_s21 = sshll.u32 %s1580_s20, 3  ;;  %1023 = vmatprep.mubr.msk.f32.mxu0 %vm475_vm0, %v322_v4  ;;  %1049 = vset.pattern.permute.xlu0 %v1067_v5  ;;  %v1202_v11 = vld [vmem:[%s1575_s2] sm:$0xff]  ;;  %v1207_v12 = vld [vmem:[%s1575_s2 + $0x8] sm:$0xff]  ;;  %vm862_vm10 = vcmask 64512   ;;  %s1582_s19 = smov (!%p244_p4, %s1105_s19), 1 }
   0xd   : > { %s242_s24 = scalar_lea.vmem %s1574_s1, %s1016_s21  ;;  %s236_s7 = scalar_lea.vmem %s1573_s0, %s1016_s21  ;;  %1050 = vset.pattern.permute.xlu1 %v1067_v5  ;;  %v1194_v8 = vshrl.u32 %v253_v7, 7  ;;  %v1196_v9 = vand.u32 127, %v253_v7  ;;  %v1299_v5 = vld [vmem:[%s1575_s2 + $0x10] ss:$0 sm:$0xff] }
   0xe   : > { %v1113_v0 = vld [vmem:[%s242_s24] sm:$0xff]  ;;  %v1119_v1 = vld [vmem:[%s242_s24 + $0x8] sm:$0xff]  ;;  %s1030_s20 = sshll.u32 %s1582_s19, 4 }
   0xf   : > { %438 = vrot.lane.b32.xlu1 %v1113_v0, %s1059_s25  ;;  %446 = vrot.lane.b32.xlu0 %v1113_v0, %s1060_s26  ;;  %v1144_v2 = vld [vmem:[%s236_s7 + $0x8] sm:$0xff]  ;;  %v1146_v3 = vld [vmem:[%s236_s7] sm:$0xff]  ;;  %v295_v10 = vsub.s32 6, %v1194_v8  ;;  %v287_v15 = vsub.s32 5, %v1194_v8  ;;  %vm374_vm1 = vcmp.lt.s32.totalorder %v1196_v9, 127  ;;  %vm383_vm2 = vcmp.lt.s32.totalorder %v1196_v9, 113  ;;  %s248_s23 = scalar_lea.vmem %s1578_s5, %s1030_s20 }
  0x10   : > { %v279_v21 = vsub.s32 3, %v1194_v8  ;;  %vm365_vm3 = vcmp.lt.s32.totalorder %v1196_v9, 1  ;;  %v271_v29 = vsub.s32 2, %v1194_v8  ;;  %v263_v34 = vsub.s32 1, %v1194_v8 }
  0x11   : > { %v1213_v16 = vrot.slane %v1207_v12, %v295_v10  ;;  %v1216_v17 = vrot.slane %v1202_v11, %v295_v10  ;;  %v1219_v18 = vrot.slane %v1207_v12, %v287_v15  ;;  %v1224_v22 = vrot.slane %v1202_v11, %v287_v15 }
  0x12   : > { %v1239_v32 = vrot.slane %v1207_v12, %v279_v21  ;;  %v1244_v36 = vrot.slane %v1202_v11, %v279_v21  ;;  %v1251_v39 = vrot.slane %v1202_v11, %v271_v29  ;;  %v1254_v40 = vrot.slane %v1207_v12, %v271_v29 }
  0x13   : > { %440 = vrot.lane.b32.xlu1 %v1119_v1, %s1059_s25  ;;  %448 = vrot.lane.b32.xlu0 %v1119_v1, %s1060_s26  ;;  %vm356_vm4 = vcmp.lt.s32.totalorder %v1196_v9, 15  ;;  %v1260_v44 = vrot.slane %v1202_v11, %v263_v34  ;;  %v255_v48 = vsub.s32 0, %v1194_v8  ;;  %v1272_v51 = vrot.slane %v1207_v12, %v263_v34 }
  0x14   : > { %vm347_vm5 = vcmp.lt.s32.totalorder %v1196_v9, 16  ;;  %vm338_vm6 = vcmp.lt.s32.totalorder %v1196_v9, 17  ;;  %vm401_vm7 = vcmp.lt.s32.totalorder %v1196_v9, 111  ;;  %vm392_vm8 = vcmp.lt.s32.totalorder %v1196_v9, 112 }
  0x15   : > { %v1280_v56 = vrot.slane %v1202_v11, %v255_v48  ;;  %v1285_v59 = vrot.slane %v1207_v12, %v255_v48 }
  0x17   : > { %432 = vrot.lane.b32.xlu1 %v1119_v1, %s1061_s27  ;;  %430 = vrot.lane.b32.xlu0 %v1113_v0, %s1061_s27 }
  0x1b   : > { %424 = vrot.lane.b32.xlu1 %v1119_v1, %s1062_s28  ;;  %422 = vrot.lane.b32.xlu0 %v1113_v0, %s1062_s28 }
  0x1f   : > { %416 = vrot.lane.b32.xlu1 %v1119_v1, %s1063_s29  ;;  %414 = vrot.lane.b32.xlu0 %v1113_v0, %s1063_s29 }
  0x23   : > { %408 = vrot.lane.b32.xlu1 %v1119_v1, %s1064_s8  ;;  %406 = vrot.lane.b32.xlu0 %v1113_v0, %s1064_s8 }
  0x27   : > { %399 = vrot.lane.b32.xlu1 %v1144_v2, %s1065_s9  ;;  %397 = vrot.lane.b32.xlu0 %v1146_v3, %s1065_s9 }
  0x2b   : > { %390 = vrot.lane.b32.xlu1 %v1144_v2, %s1066_s10  ;;  %388 = vrot.lane.b32.xlu0 %v1146_v3, %s1066_s10 }
  0x2f   : > { %381 = vrot.lane.b32.xlu1 %v1144_v2, %s1060_s26  ;;  %379 = vrot.lane.b32.xlu0 %v1146_v3, %s1060_s26 }
  0x33   : > { %372 = vrot.lane.b32.xlu1 %v1144_v2, %s1059_s25  ;;  %370 = vrot.lane.b32.xlu0 %v1146_v3, %s1059_s25 }
  0x37   : > { %363 = vrot.lane.b32.xlu1 %v1144_v2, %s1061_s27  ;;  %361 = vrot.lane.b32.xlu0 %v1146_v3, %s1061_s27 }
  0x3b   : > { %354 = vrot.lane.b32.xlu1 %v1144_v2, %s1062_s28  ;;  %352 = vrot.lane.b32.xlu0 %v1146_v3, %s1062_s28 }
  0x3f   : > { %345 = vrot.lane.b32.xlu1 %v1144_v2, %s1063_s29  ;;  %343 = vrot.lane.b32.xlu0 %v1146_v3, %s1063_s29 }
  0x43   : > { %334 = vrot.lane.b32.xlu1 %v1144_v2, %s1064_s8  ;;  %332 = vrot.lane.b32.xlu0 %v1146_v3, %s1064_s8 }
  0x47   : > { %464 = vrot.lane.b32.xlu1 %v1119_v1, %s1065_s9  ;;  %462 = vrot.lane.b32.xlu0 %v1113_v0, %s1065_s9 }
  0x4b   : > { %456 = vrot.lane.b32.xlu1 %v1119_v1, %s1066_s10  ;;  %454 = vrot.lane.b32.xlu0 %v1113_v0, %s1066_s10 }
  0x4f   : > { %472 = vperm.xlu0 %1049, %v327_v6   ;;  %v1304_v6 = vld [vmem:[%s1575_s2 + $0x18] ss:$0 sm:$0xff] }
  0x81   : > { %v439_v13 = vpop.permute.xlu1 %438  ;;  %v447_v14 = vpop.permute.xlu0 %446 }
  0x85   : > { %v441_v19 = vpop.permute.xlu1 %440  ;;  %v449_v20 = vpop.permute.xlu0 %448 }
  0x86   : > { %v443_v23 = vsel %vm374_vm1, %v441_v19, %v439_v13  ;;  %v450_v24 = vsel %vm383_vm2, %v447_v14, %v449_v20  ;;  %v451_v25 = vsel %vm383_vm2, %v449_v20, %v447_v14  ;;  %v442_v26 = vsel %vm374_vm1, %v439_v13, %v441_v19 }
  0x87   : > { %v453_v27 = vmul.f32 %v451_v25, %v1213_v16  ;;  %v452_v28 = vmul.f32 %v450_v24, %v1216_v17  ;;  %v445_v30 = vmul.f32 %v443_v23, %v1219_v18  ;;  %v444_v35 = vmul.f32 %v442_v26, %v1224_v22 }
  0x89   : > { %v433_v31 = vpop.permute.xlu1 %432  ;;  %479 = vmatprep.subr.mxu0 %v453_v27  ;;  %v431_v33 = vpop.permute.xlu0 %430 }
  0x8a   : > { %v434_v37 = vsel %vm365_vm3, %v431_v33, %v433_v31  ;;  %480 = vmatpush1.msra.mxu0 %v452_v28  ;;  %v435_v38 = vsel %vm365_vm3, %v433_v31, %v431_v33 }
  0x8b   : > { %481 = vmatprep.subr.mxu0 %v445_v30  ;;  %v437_v41 = vmul.f32 %v434_v37, %v1239_v32  ;;  %v436_v45 = vmul.f32 %v435_v38, %v1244_v36 }
  0x8c   : > { %482 = vmatpush1.msra.mxu0 %v444_v35 }
  0x8d   : > { %v425_v42 = vpop.permute.xlu1 %424  ;;  %483 = vmatprep.subr.mxu0 %v1119_v1  ;;  %v423_v43 = vpop.permute.xlu0 %422 }
  0x8e   : > { %v426_v46 = vsel %vm356_vm4, %v423_v43, %v425_v42  ;;  %v427_v47 = vsel %vm356_vm4, %v425_v42, %v423_v43  ;;  %484 = vmatpush1.msra.mxu0 %v1113_v0  ;;  %v303_v0 = vsub.s32 7, %v1194_v8 }
  0x8f   : > { %v428_v49 = vmul.f32 %v427_v47, %v1251_v39  ;;  %v429_v50 = vmul.f32 %v426_v46, %v1254_v40  ;;  %485 = vmatprep.subr.mxu0 %v437_v41 }
  0x90   : > { %486 = vmatpush1.msra.mxu0 %v436_v45  ;;  %v1311_v14 = vrot.slane %v1202_v11, %v303_v0  ;;  %v1316_v20 = vrot.slane %v1207_v12, %v303_v0 }
  0x91   : > { %v417_v52 = vpop.permute.xlu1 %416  ;;  %487 = vmatprep.subr.mxu0 %v429_v50  ;;  %v415_v53 = vpop.permute.xlu0 %414 }
  0x92   : > { %v418_v54 = vsel %vm347_vm5, %v415_v53, %v417_v52  ;;  %v419_v55 = vsel %vm347_vm5, %v417_v52, %v415_v53  ;;  %488 = vmatpush1.msra.mxu0 %v428_v49 }
  0x93   : > { %v420_v57 = vmul.f32 %v419_v55, %v1260_v44  ;;  %v421_v58 = vmul.f32 %v418_v54, %v1272_v51 }
  0x95   : > { %v409_v60 = vpop.permute.xlu1 %408  ;;  %489 = vmatprep.subr.mxu0 %v421_v58  ;;  %v407_v61 = vpop.permute.xlu0 %406 }
  0x96   : > { %v410_v62 = vsel %vm338_vm6, %v407_v61, %v409_v60  ;;  %v411_v63 = vsel %vm338_vm6, %v409_v60, %v407_v61  ;;  %490 = vmatpush1.msra.mxu0 %v420_v57 }
  0x97   : > { %v412_v1 = vmul.f32 %v411_v63, %v1280_v56  ;;  %v413_v4 = vmul.f32 %v410_v62, %v1285_v59 }
  0x99   : > { %491 = vmatprep.subr.mxu0 %v413_v4  ;;  %v400_v7 = vpop.permute.xlu1 %399  ;;  %v398_v10 = vpop.permute.xlu0 %397 }
  0x9a   : > { %v402_v8 = vsel %vm401_vm7, %v398_v10, %v400_v7  ;;  %v403_v13 = vsel %vm401_vm7, %v400_v7, %v398_v10  ;;  %492 = vmatpush1.msra.mxu0 %v412_v1 }
  0x9b   : > { %v404_v15 = vmul.f32 %v1299_v5, %v402_v8  ;;  %v405_v19 = vmul.f32 %v1304_v6, %v403_v13 }
  0x9d   : > { %v391_v21 = vpop.permute.xlu1 %390  ;;  %493 = vmatprep.subr.mxu0 %v405_v19  ;;  %v389_v23 = vpop.permute.xlu0 %388 }
  0x9e   : > { %v393_v24 = vsel %vm392_vm8, %v389_v23, %v391_v21  ;;  %v394_v25 = vsel %vm392_vm8, %v391_v21, %v389_v23  ;;  %494 = vmatpush1.msra.mxu0 %v404_v15 }
  0x9f   : > { %v395_v11 = vmul.f32 %v393_v24, %v1311_v14  ;;  %v396_v26 = vmul.f32 %v394_v25, %v1316_v20 }
  0xa1   : > { %v382_v27 = vpop.permute.xlu1 %381  ;;  %495 = vmatprep.subr.mxu0 %v396_v26  ;;  %v380_v12 = vpop.permute.xlu0 %379 }
  0xa2   : > { %v384_v28 = vsel %vm383_vm2, %v380_v12, %v382_v27  ;;  %v385_v29 = vsel %vm383_vm2, %v382_v27, %v380_v12  ;;  %496 = vmatpush1.msra.mxu0 %v395_v11  ;;  %v321_v12 = vld [vmem:[%s1576_s3] sm:$0xff] }
  0xa3   : > { %v386_v30 = vmul.f32 %v384_v28, %v1216_v17  ;;  %v387_v31 = vmul.f32 %v385_v29, %v1213_v16 }
  0xa5   : > { %v373_v33 = vpop.permute.xlu1 %372  ;;  %497 = vmatprep.subr.mxu0 %v387_v31  ;;  %v371_v34 = vpop.permute.xlu0 %370 }
  0xa6   : > { %v375_v35 = vsel %vm374_vm1, %v371_v34, %v373_v33  ;;  %v376_v37 = vsel %vm374_vm1, %v373_v33, %v371_v34  ;;  %498 = vmatpush1.msra.mxu0 %v386_v30 }
  0xa7   : > { %v377_v38 = vmul.f32 %v375_v35, %v1224_v22  ;;  %v378_v41 = vmul.f32 %v376_v37, %v1219_v18  ;;  %v1068_v37 = vmov 0.0  }
  0xa8   : > { %697 = vmatprep.mubr.f32.mxu1 %v1068_v37 }
  0xa9   : > { %v364_v42 = vpop.permute.xlu1 %363  ;;  %499 = vmatprep.subr.mxu0 %v378_v41  ;;  %v362_v43 = vpop.permute.xlu0 %361 }
  0xaa   : > { %v366_v45 = vsel %vm365_vm3, %v362_v43, %v364_v42  ;;  %v367_v46 = vsel %vm365_vm3, %v364_v42, %v362_v43  ;;  %500 = vmatpush1.msra.mxu0 %v377_v38  ;;  %v329_v38 = vld [vmem:[%s1577_s4 + $0x10] sm:$0xff] }
  0xab   : > { %v368_v47 = vmul.f32 %v367_v46, %v1244_v36  ;;  %v369_v48 = vmul.f32 %v366_v45, %v1239_v32  ;;  %501 = vmatprep.subr.mxu0 %v1144_v2 }
  0xac   : > { %502 = vmatpush1.msra.mxu0 %v1146_v3 }
  0xad   : > { %v355_v49 = vpop.permute.xlu1 %354  ;;  %503 = vmatprep.subr.mxu0 %v369_v48  ;;  %v353_v50 = vpop.permute.xlu0 %352 }
  0xae   : > { %v357_v52 = vsel %vm356_vm4, %v353_v50, %v355_v49  ;;  %v358_v53 = vsel %vm356_vm4, %v355_v49, %v353_v50  ;;  %504 = vmatpush1.msra.mxu0 %v368_v47 }
  0xaf   : > { %v359_v54 = vmul.f32 %v358_v53, %v1251_v39  ;;  %v360_v55 = vmul.f32 %v357_v52, %v1254_v40 }
  0xb1   : > { %v346_v57 = vpop.permute.xlu1 %345  ;;  %505 = vmatprep.subr.mxu0 %v360_v55  ;;  %v344_v58 = vpop.permute.xlu0 %343 }
  0xb2   : > { %v348_v2 = vsel %vm347_vm5, %v344_v58, %v346_v57  ;;  %v349_v3 = vsel %vm347_vm5, %v346_v57, %v344_v58  ;;  %506 = vmatpush1.msra.mxu0 %v359_v54 }
  0xb3   : > { %v350_v60 = vmul.f32 %v349_v3, %v1260_v44  ;;  %v351_v61 = vmul.f32 %v348_v2, %v1272_v51 }
  0xb5   : > { %v335_v62 = vpop.permute.xlu1 %334  ;;  %507 = vmatprep.subr.mxu0 %v351_v61  ;;  %v333_v63 = vpop.permute.xlu0 %332 }
  0xb6   : > { %v339_v0 = vsel %vm338_vm6, %v333_v63, %v335_v62  ;;  %v340_v1 = vsel %vm338_vm6, %v335_v62, %v333_v63  ;;  %508 = vmatpush1.msra.mxu0 %v350_v60 }
  0xb7   : > { %v341_v4 = vmul.f32 %v340_v1, %v1280_v56  ;;  %v342_v7 = vmul.f32 %v339_v0, %v1285_v59 }
  0xb9   : > { %v465_v10 = vpop.permute.xlu1 %464  ;;  %509 = vmatprep.subr.mxu0 %v342_v7  ;;  %v463_v8 = vpop.permute.xlu0 %462 }
  0xba   : > { %v466_v13 = vsel %vm401_vm7, %v463_v8, %v465_v10  ;;  %v467_v15 = vsel %vm401_vm7, %v465_v10, %v463_v8  ;;  %510 = vmatpush1.msra.mxu0 %v341_v4 }
  0xbb   : > { %v468_v19 = vmul.f32 %v1299_v5, %v466_v13  ;;  %v469_v21 = vmul.f32 %v1304_v6, %v467_v15 }
  0xbd   : > { %v457_v23 = vpop.permute.xlu1 %456  ;;  %539 = vmatprep.subr.mxu0 %v469_v21  ;;  %v455_v24 = vpop.permute.xlu0 %454 }
  0xbe   : > { %v458_v25 = vsel %vm392_vm8, %v455_v24, %v457_v23  ;;  %v459_v11 = vsel %vm392_vm8, %v457_v23, %v455_v24  ;;  %540 = vmatpush2.msra.mxu0 %v468_v19 }
  0xbf   : > { %v460_v26 = vmul.f32 %v458_v25, %v1311_v14  ;;  %v461_v27 = vmul.f32 %v459_v11, %v1316_v20 }
  0xc1   : > { %541 = vmatprep.subr.mxu0 %v461_v27 }
  0xc2   : > { %542 = vmatpush2.msra.mxu0 %v460_v26 }
  0xc3   : > { %544 = vmatmul.mubr.f32.vlgmr.msra.gmra.mxu0 %v321_v12 }
  0xc4   : > { %930 = vmatprep.mubr.f32.mxu0 %v1068_v37 }
  0xca   : > { %v473_v28 = vpop.permute.xlu0 %472 }
 0x183   : > { %v545_v29 = vpop.f32.mrf.mxu0 }
 0x184   : > { %v546_v30 = vadd.f32 %v545_v29, %v473_v28 }
 0x185   : > { %v547_v31 = vpop.f32.mrf.mxu0 }
 0x186   : > { %v1378_v33 = vmax.f32 %v546_v30, 0.0  ;;  %v548_v34 = vadd.f32 %v547_v31, %v473_v28 }
 0x188   : > { %600 = vrot.lane.b32.xlu0 %v1378_v33, %s1066_s10  ;;  %608 = vrot.lane.b32.xlu1 %v1378_v33, %s1065_s9  ;;  %v551_v35 = vmax.f32 %v548_v34, 0.0 }
 0x18c   : > { %592 = vrot.lane.b32.xlu0 %v1378_v33, %s1060_s26  ;;  %610 = vrot.lane.b32.xlu1 %v551_v35, %s1065_s9 }
 0x190   : > { %584 = vrot.lane.b32.xlu0 %v1378_v33, %s1059_s25  ;;  %602 = vrot.lane.b32.xlu1 %v551_v35, %s1066_s10 }
 0x194   : > { %576 = vrot.lane.b32.xlu0 %v1378_v33, %s1061_s27  ;;  %594 = vrot.lane.b32.xlu1 %v551_v35, %s1060_s26 }
 0x198   : > { %568 = vrot.lane.b32.xlu0 %v1378_v33, %s1062_s28  ;;  %586 = vrot.lane.b32.xlu1 %v551_v35, %s1059_s25 }
 0x19c   : > { %560 = vrot.lane.b32.xlu0 %v1378_v33, %s1063_s29  ;;  %578 = vrot.lane.b32.xlu1 %v551_v35, %s1061_s27 }
 0x1a0   : > { %552 = vrot.lane.b32.xlu0 %v1378_v33, %s1064_s8  ;;  %570 = vrot.lane.b32.xlu1 %v551_v35, %s1062_s28 }
 0x1a4   : > { %623 = vperm.xlu0 %1049, %v329_v38   ;;  %562 = vrot.lane.b32.xlu1 %v551_v35, %s1063_s29 }
 0x1a8   : > { %554 = vrot.lane.b32.xlu1 %v551_v35, %s1064_s8 }
 0x1fa   : > { %v601_v41 = vpop.permute.xlu0 %600  ;;  %v609_v42 = vpop.permute.xlu1 %608 }
 0x1fe   : > { %v593_v43 = vpop.permute.xlu0 %592  ;;  %v611_v45 = vpop.permute.xlu1 %610 }
 0x1ff   : > { %v612_v46 = vsel %vm401_vm7, %v609_v42, %v611_v45  ;;  %v613_v47 = vsel %vm401_vm7, %v611_v45, %v609_v42  ;;  %v324_v45 = vld [vmem:[%s1576_s3 + $0x20] sm:$0xff] }
 0x200   : > { %v615_v48 = vmul.f32 %v1304_v6, %v613_v47  ;;  %v614_v49 = vmul.f32 %v1299_v5, %v612_v46 }
 0x202   : > { %v585_v50 = vpop.permute.xlu0 %584  ;;  %647 = vmatprep.subr.mxu1 %v615_v48  ;;  %v603_v52 = vpop.permute.xlu1 %602 }
 0x203   : > { %v604_v53 = vsel %vm392_vm8, %v601_v41, %v603_v52  ;;  %v605_v54 = vsel %vm392_vm8, %v603_v52, %v601_v41  ;;  %648 = vmatpush1.msra.mxu1 %v614_v49 }
 0x204   : > { %v606_v55 = vmul.f32 %v604_v53, %v1311_v14  ;;  %v607_v57 = vmul.f32 %v605_v54, %v1316_v20 }
 0x206   : > { %649 = vmatprep.subr.mxu1 %v607_v57  ;;  %v595_v58 = vpop.permute.xlu1 %594  ;;  %v577_v60 = vpop.permute.xlu0 %576  ;;  %v328_v57 = vld [vmem:[%s1577_s4 + $0x8] sm:$0xff] }
 0x207   : > { %v596_v2 = vsel %vm383_vm2, %v593_v43, %v595_v58  ;;  %v597_v3 = vsel %vm383_vm2, %v595_v58, %v593_v43  ;;  %650 = vmatpush1.msra.mxu1 %v606_v55  ;;  %v323_v43 = vld [vmem:[%s1576_s3 + $0x10] sm:$0xff]  ;;  %v331_v58 = vld [vmem:[%s1577_s4 + $0x20] sm:$0xff] }
 0x208   : > { %v598_v61 = vmul.f32 %v596_v2, %v1216_v17  ;;  %v599_v62 = vmul.f32 %v597_v3, %v1213_v16 }
 0x20a   : > { %651 = vmatprep.subr.mxu1 %v599_v62  ;;  %v587_v63 = vpop.permute.xlu1 %586  ;;  %v569_v10 = vpop.permute.xlu0 %568 }
 0x20b   : > { %v588_v0 = vsel %vm374_vm1, %v585_v50, %v587_v63  ;;  %v589_v1 = vsel %vm374_vm1, %v587_v63, %v585_v50  ;;  %652 = vmatpush1.msra.mxu1 %v598_v61 }
 0x20c   : > { %v590_v4 = vmul.f32 %v588_v0, %v1224_v22  ;;  %v591_v7 = vmul.f32 %v589_v1, %v1219_v18 }
 0x20e   : > { %653 = vmatprep.subr.mxu1 %v591_v7  ;;  %v579_v8 = vpop.permute.xlu1 %578  ;;  %v561_v11 = vpop.permute.xlu0 %560 }
 0x20f   : > { %v580_v13 = vsel %vm365_vm3, %v577_v60, %v579_v8  ;;  %v581_v15 = vsel %vm365_vm3, %v579_v8, %v577_v60  ;;  %654 = vmatpush1.msra.mxu1 %v590_v4 }
 0x210   : > { %v582_v19 = vmul.f32 %v581_v15, %v1244_v36  ;;  %v583_v21 = vmul.f32 %v580_v13, %v1239_v32  ;;  %655 = vmatprep.subr.mxu1 %v551_v35 }
 0x211   : > { %656 = vmatpush1.msra.mxu1 %v1378_v33 }
 0x212   : > { %657 = vmatprep.subr.mxu1 %v583_v21  ;;  %v571_v23 = vpop.permute.xlu1 %570  ;;  %v553_v33 = vpop.permute.xlu0 %552 }
 0x213   : > { %v572_v24 = vsel %vm356_vm4, %v569_v10, %v571_v23  ;;  %v573_v25 = vsel %vm356_vm4, %v571_v23, %v569_v10  ;;  %658 = vmatpush1.msra.mxu1 %v582_v19 }
 0x214   : > { %v574_v26 = vmul.f32 %v573_v25, %v1251_v39  ;;  %v575_v27 = vmul.f32 %v572_v24, %v1254_v40 }
 0x216   : > { %659 = vmatprep.subr.mxu1 %v575_v27  ;;  %v563_v12 = vpop.permute.xlu1 %562 }
 0x217   : > { %v564_v28 = vsel %vm347_vm5, %v561_v11, %v563_v12  ;;  %v565_v29 = vsel %vm347_vm5, %v563_v12, %v561_v11  ;;  %660 = vmatpush1.msra.mxu1 %v574_v26 }
 0x218   : > { %v566_v30 = vmul.f32 %v565_v29, %v1260_v44  ;;  %v567_v31 = vmul.f32 %v564_v28, %v1272_v51 }
 0x21a   : > { %661 = vmatprep.subr.mxu1 %v567_v31  ;;  %v555_v34 = vpop.permute.xlu1 %554 }
 0x21b   : > { %v556_v35 = vsel %vm338_vm6, %v553_v33, %v555_v34  ;;  %v557_v38 = vsel %vm338_vm6, %v555_v34, %v553_v33  ;;  %662 = vmatpush1.msra.mxu1 %v566_v30 }
 0x21c   : > { %v558_v41 = vmul.f32 %v557_v38, %v1280_v56  ;;  %v559_v42 = vmul.f32 %v556_v35, %v1285_v59 }
 0x21e   : > { %663 = vmatprep.subr.mxu1 %v559_v42 }
 0x21f   : > { %664 = vmatpush1.msra.mxu1 %v558_v41  ;;  %v624_v48 = vpop.permute.xlu0 %623 }
 0x220   : > { %1024 = vmatmul.mubr.msk.f32.vlgmr.msra.gmra.mxu1 %vm626_vm9, %v323_v43 }
 0x221   : > { %703 = vmatprep.mubr.f32.mxu1 %v1068_v37 }
 0x224   : > { %1025 = vmatmul.mubr.msk.f32.gmra.mxu1 %vm626_vm9, %v324_v45 }
 0x225   : > { %848 = vmatprep.mubr.f32.mxu1 %v1068_v37  ;;  %v330_v37 = vld [vmem:[%s1577_s4 + $0x18] sm:$0xff] }
 0x2e0   : > { %v1468_v46 = vpop.f32.mrf.mxu1 }
 0x2e2   : > { %v1470_v47 = vpop.f32.mrf.mxu1 }
 0x2e4   : > { %v705_v49 = vpop.f32.mrf.mxu1 }
 0x2e5   : > { %v706_v50 = vadd.f32 %v705_v49, %v624_v48 }
 0x2e6   : > { %v707_v52 = vpop.f32.mrf.mxu1 }
 0x2e7   : > { %v1472_v53 = vmax.f32 %v706_v50, 0.0  ;;  %v708_v54 = vadd.f32 %v707_v52, %v624_v48 }
 0x2e9   : > { %v711_v55 = vmax.f32 %v708_v54, 0.0  ;;  %768 = vrot.lane.b32.xlu1 %v1472_v53, %s1065_s9 }
 0x2eb   : > { %770 = vrot.lane.b32.xlu0 %v711_v55, %s1065_s9 }
 0x2ed   : > { %760 = vrot.lane.b32.xlu1 %v1472_v53, %s1066_s10 }
 0x2ef   : > { %762 = vrot.lane.b32.xlu0 %v711_v55, %s1066_s10 }
 0x2f1   : > { %752 = vrot.lane.b32.xlu1 %v1472_v53, %s1060_s26 }
 0x2f3   : > { %754 = vrot.lane.b32.xlu0 %v711_v55, %s1060_s26 }
 0x2f5   : > { %744 = vrot.lane.b32.xlu1 %v1472_v53, %s1059_s25 }
 0x2f7   : > { %746 = vrot.lane.b32.xlu0 %v711_v55, %s1059_s25 }
 0x2f9   : > { %736 = vrot.lane.b32.xlu1 %v1472_v53, %s1061_s27 }
 0x2fb   : > { %738 = vrot.lane.b32.xlu0 %v711_v55, %s1061_s27 }
 0x2fd   : > { %728 = vrot.lane.b32.xlu1 %v1472_v53, %s1062_s28 }
 0x2ff   : > { %730 = vrot.lane.b32.xlu0 %v711_v55, %s1062_s28 }
 0x301   : > { %720 = vrot.lane.b32.xlu1 %v1472_v53, %s1063_s29 }
 0x303   : > { %722 = vrot.lane.b32.xlu0 %v711_v55, %s1063_s29 }
 0x305   : > { %712 = vrot.lane.b32.xlu1 %v1472_v53, %s1064_s8 }
 0x307   : > { %714 = vrot.lane.b32.xlu0 %v711_v55, %s1064_s8 }
 0x309   : > { %778 = vperm.xlu1 %1050, %v330_v37  }
 0x30b   : > { %618 = vperm.xlu0 %1049, %v328_v57  }
 0x30d   : > { %859 = vperm.xlu1 %1050, %v331_v58  }
 0x35b   : > { %v769_v2 = vpop.permute.xlu1 %768 }
 0x35d   : > { %v771_v3 = vpop.permute.xlu0 %770 }
 0x35e   : > { %v772_v60 = vsel %vm401_vm7, %v769_v2, %v771_v3  ;;  %v773_v61 = vsel %vm401_vm7, %v771_v3, %v769_v2 }
 0x35f   : > { %v774_v62 = vmul.f32 %v1299_v5, %v772_v60  ;;  %v775_v63 = vmul.f32 %v1304_v6, %v773_v61  ;;  %v761_v0 = vpop.permute.xlu1 %760 }
 0x361   : > { %v763_v1 = vpop.permute.xlu0 %762  ;;  %798 = vmatprep.subr.mxu1 %v775_v63 }
 0x362   : > { %v764_v4 = vsel %vm392_vm8, %v761_v0, %v763_v1  ;;  %v765_v7 = vsel %vm392_vm8, %v763_v1, %v761_v0  ;;  %799 = vmatpush1.msra.mxu1 %v774_v62 }
 0x363   : > { %v766_v10 = vmul.f32 %v764_v4, %v1311_v14  ;;  %v767_v8 = vmul.f32 %v765_v7, %v1316_v20  ;;  %v753_v13 = vpop.permute.xlu1 %752 }
 0x365   : > { %v755_v15 = vpop.permute.xlu0 %754  ;;  %800 = vmatprep.subr.mxu1 %v767_v8 }
 0x366   : > { %v756_v5 = vsel %vm383_vm2, %v753_v13, %v755_v15  ;;  %v757_v6 = vsel %vm383_vm2, %v755_v15, %v753_v13  ;;  %801 = vmatpush1.msra.mxu1 %v766_v10 }
 0x367   : > { %v758_v19 = vmul.f32 %v756_v5, %v1216_v17  ;;  %v759_v21 = vmul.f32 %v757_v6, %v1213_v16  ;;  %v745_v23 = vpop.permute.xlu1 %744 }
 0x369   : > { %v747_v24 = vpop.permute.xlu0 %746  ;;  %802 = vmatprep.subr.mxu1 %v759_v21 }
 0x36a   : > { %v748_v14 = vsel %vm374_vm1, %v745_v23, %v747_v24  ;;  %v749_v20 = vsel %vm374_vm1, %v747_v24, %v745_v23  ;;  %803 = vmatpush1.msra.mxu1 %v758_v19 }
 0x36b   : > { %v750_v25 = vmul.f32 %v748_v14, %v1224_v22  ;;  %v751_v11 = vmul.f32 %v749_v20, %v1219_v18  ;;  %v737_v26 = vpop.permute.xlu1 %736 }
 0x36d   : > { %v739_v27 = vpop.permute.xlu0 %738  ;;  %804 = vmatprep.subr.mxu1 %v751_v11 }
 0x36e   : > { %v740_v16 = vsel %vm365_vm3, %v737_v26, %v739_v27  ;;  %v741_v17 = vsel %vm365_vm3, %v739_v27, %v737_v26  ;;  %805 = vmatpush1.msra.mxu1 %v750_v25 }
 0x36f   : > { %v742_v12 = vmul.f32 %v741_v17, %v1244_v36  ;;  %v743_v28 = vmul.f32 %v740_v16, %v1239_v32  ;;  %806 = vmatprep.subr.mxu1 %v711_v55  ;;  %v729_v29 = vpop.permute.xlu1 %728 }
 0x370   : > { %807 = vmatpush1.msra.mxu1 %v1472_v53 }
 0x371   : > { %v731_v22 = vpop.permute.xlu0 %730  ;;  %808 = vmatprep.subr.mxu1 %v743_v28 }
 0x372   : > { %v732_v18 = vsel %vm356_vm4, %v729_v29, %v731_v22  ;;  %v733_v30 = vsel %vm356_vm4, %v731_v22, %v729_v29  ;;  %809 = vmatpush1.msra.mxu1 %v742_v12 }
 0x373   : > { %v734_v31 = vmul.f32 %v733_v30, %v1251_v39  ;;  %v735_v33 = vmul.f32 %v732_v18, %v1254_v40  ;;  %v721_v36 = vpop.permute.xlu1 %720 }
 0x375   : > { %v723_v34 = vpop.permute.xlu0 %722  ;;  %810 = vmatprep.subr.mxu1 %v735_v33 }
 0x376   : > { %v724_v32 = vsel %vm347_vm5, %v721_v36, %v723_v34  ;;  %v725_v35 = vsel %vm347_vm5, %v723_v34, %v721_v36  ;;  %811 = vmatpush1.msra.mxu1 %v734_v31 }
 0x377   : > { %v726_v38 = vmul.f32 %v725_v35, %v1260_v44  ;;  %v727_v41 = vmul.f32 %v724_v32, %v1272_v51  ;;  %v713_v42 = vpop.permute.xlu1 %712  ;;  %v325_v44 = vld [vmem:[%s1576_s3 + $0x30] sm:$0xff] }
 0x379   : > { %v715_v43 = vpop.permute.xlu0 %714  ;;  %812 = vmatprep.subr.mxu1 %v727_v41 }
 0x37a   : > { %v716_v39 = vsel %vm338_vm6, %v713_v42, %v715_v43  ;;  %v717_v40 = vsel %vm338_vm6, %v715_v43, %v713_v42  ;;  %813 = vmatpush1.msra.mxu1 %v726_v38 }
 0x37b   : > { %v718_v45 = vmul.f32 %v717_v40, %v1280_v56  ;;  %v719_v48 = vmul.f32 %v716_v39, %v1285_v59  ;;  %v326_v56 = vld [vmem:[%s1576_s3 + $0x40] sm:$0xff] }
 0x37d   : > { %814 = vmatprep.subr.mxu1 %v719_v48 }
 0x37e   : > { %815 = vmatpush1.msra.mxu1 %v718_v45 }
 0x37f   : > { %1026 = vmatmul.mubr.msk.f32.vlgmr.msra.gmra.mxu1 %vm626_vm9, %v325_v44 }
 0x384   : > { %v779_v49 = vpop.permute.xlu1 %778 }
 0x386   : > { %v619_v59 = vpop.permute.xlu0 %618 }
 0x387   : > { %v700_v57 = vadd.f32 %v1468_v46, %v619_v59  ;;  %v702_v3 = vadd.f32 %v1470_v47, %v619_v59 }
 0x388   : > { %v860_v55 = vpop.permute.xlu1 %859 }
 0x43f   : > { %v850_v51 = vpop.f32.mrf.mxu1 }
 0x440   : > { %v851_v50 = vadd.f32 %v850_v51, %v779_v49 }
 0x441   : > { %v852_v9 = vpop.f32.mrf.mxu1 }
 0x442   : > { %v853_v52 = vadd.f32 %v852_v9, %v779_v49  ;;  %v855_v54 = vmax.f32 %v851_v50, 0.0 }
 0x444   : > { %v856_v53 = vmax.f32 %v853_v52, 0.0 }
 0x446   : > { %896 = vmatprep.subr.mxu0 %v856_v53 }
 0x447   : > { %897 = vmatpush1.msra.mxu0 %v855_v54 }
 0x448   : > { %1027 = vmatmul.mubr.msk.f32.vlgmr.msra.gmra.mxu0 %vm862_vm10, %v326_v56 }
 0x508   : > { %v932_v37 = vpop.f32.mrf.mxu0 }
 0x509   : > { %v933_v58 = vadd.f32 %v932_v37, %v860_v55 }
 0x50a   : > { %v934_v2 = vpop.f32.mrf.mxu0 }
 0x50b   : > { %v937_v60 = vadd.f32 %v933_v58, %v700_v57  ;;  %v935_v61 = vadd.f32 %v934_v2, %v860_v55 }
 0x50d   : > { %v939_v62 = vmax.f32 %v937_v60, 0.0  ;;  %v938_v63 = vadd.f32 %v935_v61, %v702_v3 }
 0x50f   : > { %941 = vst [vmem:[%s248_s23] sm:$0xff] %v939_v62  ;;  %v940_v0 = vmax.f32 %v938_v63, 0.0 }
 0x511   : > { %942 = vst [vmem:[%s248_s23 + $0x8] sm:$0xff] %v940_v0 }
 0x512 PF: > { %s15_s18 = sadd.s32 1, %s1057_s18  }
 0x513   : > { %p12_p5 = scmp.ge.s32.totalorder %s15_s18, 4  }
 0x515   :  { %14 = sbr.rel (!%p12_p5) target bundleno = 1 (0x1), region = 73 }

</bundles_post_ra>
